<compile_context>
chip_gen: v7x
topology: tpu7x:2x2x1
jax: 0.10.0
libtpu: 0.0.40
codegen_flags: <defaults>
</compile_context>

<pallas_src>
import math

import jax
import jax.numpy as jnp
from jax.experimental import pallas as pl
from jax.experimental.pallas import tpu as pltpu

# ---- packed parameter layout: row ranges inside the (PACKED_ROWS, 128) buffer ----
# All offsets / lengths are multiples of 16 so static slices stay tile-aligned for
# both f32 (8,128) and bf16 (16,128) sublane tiling.
W1_OFF, W1_ROWS = 0, 16      # l1: (6, 64)    zero-padded to (16, 128)
W2_OFF, W2_ROWS = 16, 128    # l2: (64, 128)  zero-padded to (128, 128)
W3_OFF, W3_ROWS = 144, 128   # l3: (128, 128)
W4_OFF, W4_ROWS = 272, 128   # l4: (128, 64)  zero-padded to (128, 128)
W5_OFF, W5_ROWS = 400, 128   # l5: (64, A)    zero-padded to (128, 128)
B_OFF,  B_ROWS  = 528, 16    # rows 0..4 = b1..b5 (b5 lane-padded with -1e30)
PACKED_ROWS = 544
LANES = 128
IN_PAD = 16                  # input features 6 -> 16 (matches W1's padded K rows)
NEG_INF = -1e30


def policy_net_kernel(x_ref, p_ref, o_ref):
    cdt = p_ref.dtype                        # MXU operand dtype (bf16 by default)
    x = x_ref[...].astype(cdt)               # (bm, 16)

    w1 = p_ref[W1_OFF:W1_OFF + W1_ROWS, :]   # (16, 128)
    w2 = p_ref[W2_OFF:W2_OFF + W2_ROWS, :]   # (128, 128)
    w3 = p_ref[W3_OFF:W3_OFF + W3_ROWS, :]   # (128, 128)
    w4 = p_ref[W4_OFF:W4_OFF + W4_ROWS, :]   # (128, 128)
    w5 = p_ref[W5_OFF:W5_OFF + W5_ROWS, :]   # (128, 128)
    b = p_ref[B_OFF:B_OFF + B_ROWS, :].astype(jnp.float32)   # (16, 128)

    def dense(h, w, r):                      # f32 accumulation on the MXU
        return jnp.dot(h, w, preferred_element_type=jnp.float32) + b[r:r + 1, :]

    h = jnp.maximum(dense(x, w1, 0), 0.0).astype(cdt)
    h = jnp.maximum(dense(h, w2, 1), 0.0).astype(cdt)
    h = jnp.maximum(dense(h, w3, 2), 0.0).astype(cdt)
    h = jnp.maximum(dense(h, w4, 3), 0.0).astype(cdt)
    logits = dense(h, w5, 4)                 # (bm, 128) f32

    # Numerically-stable softmax over the action (lane) axis.  Padded action lanes
    # carry a -1e30 bias, so exp() underflows to exactly 0 there and they drop out
    # of both the max and the sum; only the first action_size lanes are stored.
    m = jnp.max(logits, axis=1, keepdims=True)
    e = jnp.exp(logits - m)
    denom = jnp.sum(e, axis=1, keepdims=True)
    probs = e * pl.reciprocal(denom, approx=True)
    o_ref[...] = probs[:, :o_ref.shape[1]]


def pack_params(params, action_size, dtype=jnp.bfloat16):
    """Pack w1..w5, b1..b5 into one lane-dense (PACKED_ROWS, 128) buffer."""
    def pad_to(a, rows, cols):
        a = jnp.asarray(a, jnp.float32)
        return jnp.pad(a, ((0, rows - a.shape[0]), (0, cols - a.shape[1])))

    def bias_row(name):
        return jnp.asarray(params[name], jnp.float32).reshape(1, -1)

    # padded action lanes get -1e30 so softmax assigns them exactly zero probability
    b5_row = jnp.concatenate(
        [bias_row("b5"),
         jnp.full((1, LANES - action_size), NEG_INF, jnp.float32)], axis=1)
    bias_block = jnp.concatenate([
        pad_to(bias_row("b1"), 1, LANES),
        pad_to(bias_row("b2"), 1, LANES),
        pad_to(bias_row("b3"), 1, LANES),
        pad_to(bias_row("b4"), 1, LANES),
        b5_row,
        jnp.zeros((B_ROWS - 5, LANES), jnp.float32),
    ], axis=0)

    packed = jnp.concatenate([
        pad_to(params["w1"], W1_ROWS, LANES),
        pad_to(params["w2"], W2_ROWS, LANES),
        pad_to(params["w3"], W3_ROWS, LANES),
        pad_to(params["w4"], W4_ROWS, LANES),
        pad_to(params["w5"], W5_ROWS, LANES),
        bias_block,
    ], axis=0)                                # (544, 128)
    return packed.astype(dtype)


def policy_net_forward(x, params, action_size, *, bm=2048, param_dtype=jnp.bfloat16):
    """x: (B, 6) float32. Returns (B, action_size) softmax probabilities (f32)."""
    assert x.shape[1] == 6 and 1 <= action_size <= LANES
    B = x.shape[0]

    # pad features 6 -> IN_PAD (matches W1's padded contraction rows)
    # TODO(synk): this tiny host-side pad could be folded into the producer / an
    # in-kernel 6-row W1 slice; kept here for simplicity (x is only ~24 B/row).
    xp = jnp.pad(x.astype(jnp.float32), ((0, 0), (0, IN_PAD - x.shape[1])))

    # Batch tiling: tiles <= bm (VMEM-friendly, esp. v7x 64 MiB / 32 MiB scoped),
    # and >= 2 grid steps whenever the batch allows it so the "parallel" axis
    # actually uses both v7x TensorCores.
    b_pad = max(8, pl.cdiv(B, 8) * 8)
    n_steps = pl.cdiv(b_pad, bm)
    if b_pad >= 16:
        n_steps = max(n_steps, 2)
    bm = pl.cdiv(pl.cdiv(b_pad, n_steps), 8) * 8
    b_pad = n_steps * bm
    xp = jnp.pad(xp, ((0, b_pad - B), (0, 0)))

    packed = pack_params(params, action_size, dtype=param_dtype)

    out = pl.pallas_call(
        policy_net_kernel,
        out_shape=jax.ShapeDtypeStruct((b_pad, action_size), jnp.float32),
        grid=(n_steps,),
        in_specs=[
            pl.BlockSpec((bm, IN_PAD), lambda i: (i, 0)),            # batch-tiled x
            pl.BlockSpec((PACKED_ROWS, LANES), lambda i: (0, 0)),    # weights resident
        ],
        out_specs=pl.BlockSpec((bm, action_size), lambda i: (i, 0)),  # A lanes only
        compiler_params=pltpu.CompilerParams(
            dimension_semantics=("parallel",)),                       # both TCs on v7x
    )(xp, packed)
    return out[:B]


def init_policy_net_params(key, action_size):
    """PyTorch nn.Linear-style init: U(-1/sqrt(fan_in), 1/sqrt(fan_in)) for W and b.
    Weights stored (in_features, out_features) so the kernel computes x @ W + b."""
    dims = [(6, 64), (64, 128), (128, 128), (128, 64), (64, action_size)]
    params = {}
    for i, (fan_in, fan_out) in enumerate(dims, start=1):
        key, kw, kb = jax.random.split(key, 3)
        bound = 1.0 / math.sqrt(fan_in)
        params[f"w{i}"] = jax.random.uniform(
            kw, (fan_in, fan_out), jnp.float32, -bound, bound)
        params[f"b{i}"] = jax.random.uniform(
            kb, (1, fan_out), jnp.float32, -bound, bound)
    return params


def policy_net_reference(x, params):
    h = x
    for i in range(1, 5):
        h = jnp.maximum(h @ params[f"w{i}"] + params[f"b{i}"], 0.0)
    logits = h @ params["w5"] + params["b5"]
    return jax.nn.softmax(logits, axis=1)


if __name__ == "__main__":
    key = jax.random.PRNGKey(0)
    action_size = 8
    batch = 2

    k_x, k_p = jax.random.split(key)
    x = jax.random.normal(k_x, (batch, 6), dtype=jnp.float32)
    params = init_policy_net_params(k_p, action_size)
    ref = policy_net_reference(x, params)

    # bf16 MXU-operand path (default): f32 accumulation, small operand-rounding error
    out = jax.block_until_ready(policy_net_forward(x, params, action_size))
    assert out.shape == (batch, action_size)
    assert bool(jnp.allclose(jnp.sum(out, axis=1), 1.0, atol=2e-3))
    assert bool(jnp.allclose(out, ref, rtol=1e-2, atol=1e-3))

    # f32 path: matches the PyTorch f32 forward (modulo the approx reciprocal)
    out_f32 = jax.block_until_ready(
        policy_net_forward(x, params, action_size, param_dtype=jnp.float32))
    assert bool(jnp.allclose(out_f32, ref, rtol=2e-3, atol=5e-4))

    print("KERNEL_OK")
</pallas_src>

<mosaic_0001>
module attributes {stable_mosaic.version = 11 : i64} {
  func.func @policy_net_kernel(%arg0: i32, %arg1: memref<8x16xf32, #tpu.memory_space<vmem>>, %arg2: memref<544x128xbf16, #tpu.memory_space<vmem>>, %arg3: memref<8x8xf32, #tpu.memory_space<vmem>>) attributes {dimension_semantics = [#tpu.dimension_semantics<parallel>], iteration_bounds = array<i64: 1>, scalar_prefetch = 0 : i64, scratch_operands = 0 : i64, tpu.core_type = #tpu.core_type<tc>, window_params = [{transform_indices = @transform_0, window_bounds = array<i64: 8, 16>}, {pipeline_mode = #tpu.pipeline_mode<synchronous>, transform_indices = @transform_1, window_bounds = array<i64: 544, 128>}, {transform_indices = @transform_2, window_bounds = array<i64: 8, 8>}]} {
    %c0 = arith.constant 0 : index
    %c0_0 = arith.constant 0 : index
    %0 = vector.load %arg1[%c0, %c0_0] : memref<8x16xf32, #tpu.memory_space<vmem>>, vector<8x16xf32>
    %1 = arith.truncf %0 : vector<8x16xf32> to vector<8x16xbf16>
    %c0_1 = arith.constant 0 : index
    %c0_2 = arith.constant 0 : index
    %2 = vector.load %arg2[%c0_1, %c0_2] : memref<544x128xbf16, #tpu.memory_space<vmem>>, vector<16x128xbf16>
    %c16 = arith.constant 16 : index
    %c0_3 = arith.constant 0 : index
    %3 = vector.load %arg2[%c16, %c0_3] : memref<544x128xbf16, #tpu.memory_space<vmem>>, vector<128x128xbf16>
    %c144 = arith.constant 144 : index
    %c0_4 = arith.constant 0 : index
    %4 = vector.load %arg2[%c144, %c0_4] : memref<544x128xbf16, #tpu.memory_space<vmem>>, vector<128x128xbf16>
    %c272 = arith.constant 272 : index
    %c0_5 = arith.constant 0 : index
    %5 = vector.load %arg2[%c272, %c0_5] : memref<544x128xbf16, #tpu.memory_space<vmem>>, vector<128x128xbf16>
    %c400 = arith.constant 400 : index
    %c0_6 = arith.constant 0 : index
    %6 = vector.load %arg2[%c400, %c0_6] : memref<544x128xbf16, #tpu.memory_space<vmem>>, vector<128x128xbf16>
    %c528 = arith.constant 528 : index
    %c0_7 = arith.constant 0 : index
    %7 = vector.load %arg2[%c528, %c0_7] : memref<544x128xbf16, #tpu.memory_space<vmem>>, vector<16x128xbf16>
    %8 = arith.extf %7 : vector<16x128xbf16> to vector<16x128xf32>
    %cst = arith.constant dense<0.000000e+00> : vector<8x128xf32>
    %9 = tpu.matmul %1, %2, %cst {dimension_numbers = #tpu.dot_dimension_numbers<[1], [0], [0], [1], [0, 0, 1, 1], [], []>} : vector<8x16xbf16>, vector<16x128xbf16>, vector<8x128xf32> -> vector<8x128xf32>
    %10 = vector.extract_strided_slice %8 {offsets = [0, 0], sizes = [1, 128], strides = [1, 1]} : vector<16x128xf32> to vector<1x128xf32>
    %11 = vector.broadcast %10 : vector<1x128xf32> to vector<8x128xf32>
    %12 = arith.addf %9, %11 : vector<8x128xf32>
    %cst_8 = arith.constant 0.000000e+00 : f32
    %13 = vector.broadcast %cst_8 : f32 to vector<8x128xf32>
    %14 = arith.maximumf %12, %13 : vector<8x128xf32>
    %15 = arith.truncf %14 : vector<8x128xf32> to vector<8x128xbf16>
    %cst_9 = arith.constant dense<0.000000e+00> : vector<8x128xf32>
    %16 = tpu.matmul %15, %3, %cst_9 {dimension_numbers = #tpu.dot_dimension_numbers<[1], [0], [0], [1], [0, 0, 1, 1], [], []>} : vector<8x128xbf16>, vector<128x128xbf16>, vector<8x128xf32> -> vector<8x128xf32>
    %17 = vector.extract_strided_slice %8 {offsets = [1, 0], sizes = [1, 128], strides = [1, 1]} : vector<16x128xf32> to vector<1x128xf32>
    %18 = vector.broadcast %17 : vector<1x128xf32> to vector<8x128xf32>
    %19 = arith.addf %16, %18 : vector<8x128xf32>
    %cst_10 = arith.constant 0.000000e+00 : f32
    %20 = vector.broadcast %cst_10 : f32 to vector<8x128xf32>
    %21 = arith.maximumf %19, %20 : vector<8x128xf32>
    %22 = arith.truncf %21 : vector<8x128xf32> to vector<8x128xbf16>
    %cst_11 = arith.constant dense<0.000000e+00> : vector<8x128xf32>
    %23 = tpu.matmul %22, %4, %cst_11 {dimension_numbers = #tpu.dot_dimension_numbers<[1], [0], [0], [1], [0, 0, 1, 1], [], []>} : vector<8x128xbf16>, vector<128x128xbf16>, vector<8x128xf32> -> vector<8x128xf32>
    %24 = vector.extract_strided_slice %8 {offsets = [2, 0], sizes = [1, 128], strides = [1, 1]} : vector<16x128xf32> to vector<1x128xf32>
    %25 = vector.broadcast %24 : vector<1x128xf32> to vector<8x128xf32>
    %26 = arith.addf %23, %25 : vector<8x128xf32>
    %cst_12 = arith.constant 0.000000e+00 : f32
    %27 = vector.broadcast %cst_12 : f32 to vector<8x128xf32>
    %28 = arith.maximumf %26, %27 : vector<8x128xf32>
    %29 = arith.truncf %28 : vector<8x128xf32> to vector<8x128xbf16>
    %cst_13 = arith.constant dense<0.000000e+00> : vector<8x128xf32>
    %30 = tpu.matmul %29, %5, %cst_13 {dimension_numbers = #tpu.dot_dimension_numbers<[1], [0], [0], [1], [0, 0, 1, 1], [], []>} : vector<8x128xbf16>, vector<128x128xbf16>, vector<8x128xf32> -> vector<8x128xf32>
    %31 = vector.extract_strided_slice %8 {offsets = [3, 0], sizes = [1, 128], strides = [1, 1]} : vector<16x128xf32> to vector<1x128xf32>
    %32 = vector.broadcast %31 : vector<1x128xf32> to vector<8x128xf32>
    %33 = arith.addf %30, %32 : vector<8x128xf32>
    %cst_14 = arith.constant 0.000000e+00 : f32
    %34 = vector.broadcast %cst_14 : f32 to vector<8x128xf32>
    %35 = arith.maximumf %33, %34 : vector<8x128xf32>
    %36 = arith.truncf %35 : vector<8x128xf32> to vector<8x128xbf16>
    %cst_15 = arith.constant dense<0.000000e+00> : vector<8x128xf32>
    %37 = tpu.matmul %36, %6, %cst_15 {dimension_numbers = #tpu.dot_dimension_numbers<[1], [0], [0], [1], [0, 0, 1, 1], [], []>} : vector<8x128xbf16>, vector<128x128xbf16>, vector<8x128xf32> -> vector<8x128xf32>
    %38 = vector.extract_strided_slice %8 {offsets = [4, 0], sizes = [1, 128], strides = [1, 1]} : vector<16x128xf32> to vector<1x128xf32>
    %39 = vector.broadcast %38 : vector<1x128xf32> to vector<8x128xf32>
    %40 = arith.addf %37, %39 : vector<8x128xf32>
    %cst_16 = arith.constant dense<0xFF800000> : vector<8xf32>
    %41 = vector.multi_reduction <maximumf>, %40, %cst_16 [1] : vector<8x128xf32> to vector<8xf32>
    %42 = vector.shape_cast %41 : vector<8xf32> to vector<8x1xf32>
    %43 = vector.broadcast %42 : vector<8x1xf32> to vector<8x128xf32>
    %44 = arith.subf %40, %43 : vector<8x128xf32>
    %45 = math.exp %44 : vector<8x128xf32>
    %cst_17 = arith.constant dense<0.000000e+00> : vector<8xf32>
    %46 = vector.multi_reduction <add>, %45, %cst_17 [1] : vector<8x128xf32> to vector<8xf32>
    %47 = vector.shape_cast %46 : vector<8xf32> to vector<8x1xf32>
    %48 = tpu.reciprocal %47 {approx = true} : vector<8x1xf32> -> vector<8x1xf32>
    %49 = vector.broadcast %48 : vector<8x1xf32> to vector<8x128xf32>
    %50 = arith.mulf %45, %49 : vector<8x128xf32>
    %51 = vector.extract_strided_slice %50 {offsets = [0, 0], sizes = [8, 8], strides = [1, 1]} : vector<8x128xf32> to vector<8x8xf32>
    %c0_18 = arith.constant 0 : index
    %c0_19 = arith.constant 0 : index
    %52 = vector.load %arg3[%c0_18, %c0_19] : memref<8x8xf32, #tpu.memory_space<vmem>>, vector<8x8xf32>
    tpu.vector_store %arg3[%c0_18, %c0_19], %51 {strides = array<i32>} : memref<8x8xf32, #tpu.memory_space<vmem>>, vector<8x8xf32>,
    return
  }
  func.func @transform_0(%arg0: i32) -> (i32, i32) {
    %c0_i32 = arith.constant 0 : i32
    %c0_i32_0 = arith.constant 0 : i32
    return %arg0, %c0_i32 : i32, i32
  }
  func.func @transform_1(%arg0: i32) -> (i32, i32) {
    %c0_i32 = arith.constant 0 : i32
    %c0_i32_0 = arith.constant 0 : i32
    %c0_i32_1 = arith.constant 0 : i32
    return %c0_i32, %c0_i32_0 : i32, i32
  }
  func.func @transform_2(%arg0: i32) -> (i32, i32) {
    %c0_i32 = arith.constant 0 : i32
    %c0_i32_0 = arith.constant 0 : i32
    return %arg0, %c0_i32 : i32, i32
  }
}

</mosaic_0001>

<bundles_post_ra>
// kernel: tpu_custom_call.1
= control target key start
LH: loop header
LB: loop body
LE: loop exit
PB: predicated region body
PF: predicated region fallthrough
CT: control target
= control target key end

     0   :  { %7 = vsyncpa [#allocation3], 0  ;;  %s962_s0 = inlined_call_operand.hbm [shape: f32[8,16], index: 0, kind: input, shape index: {}]   ;;  %s963_s1 = inlined_call_operand.hbm [shape: bf16[544,128], index: 1, kind: input, shape index: {}]   ;;  %s964_s2 = inlined_call_operand.hbm [shape: f32[8,8], index: 2, kind: output, shape index: {}]  }
   0x1   :  { %8 = vsyncpa [#allocation6], 0 }
   0x2   :  { %9 = vsyncpa [#allocation4], 0  ;;  %s840_s9 = smov [#allocation2]   ;;  %s841_s11 = smov [#allocation5]  }
   0x3   :  { %s16_s10 = sshll.u32 %s840_s9, 4  ;;  %s25_s12 = sshll.u32 %s841_s11, 4  ;;  %s17_s10 = int_to_ptr.vmem [resolvable:$true] %s16_s10  ;;  %s862_s12 = int_to_ptr.vmem [resolvable:$true] %s25_s12 }
   0x4   :  { %s768_s15 = scalar_lea.hbm %s962_s0, 128 }
   0x5   :  { %p769_p0 = scmp.ne.s32.totalorder %s962_s0, %s768_s15  ;;  %p772_p1 = scmp.lt.u32.totalorder %s768_s15, %s962_s0 }
   0x7   :  { %p774_p2 = pnand %p772_p1, %p769_p0 }
   0x9   :  { %777 = shalt.err (!%p774_p2)
}
   0xa   :  { %s778_s20 = scalar_lea.vmem %s17_s10, 128  ;;  %p783_p4 = scmp.lt.s32.totalorder %s17_s10, %s17_s10 }
   0xb   :  { %p779_p3 = scmp.ne.s32.totalorder %s17_s10, %s778_s20  ;;  %p784_p5 = scmp.lt.s32.totalorder %s778_s20, %s778_s20 }
   0xd   :  { %p785_p6 = por %p784_p5, %p783_p4 }
   0xf   :  { %p786_p7 = pnand %p785_p6, %p779_p3 }
  0x11   :  { %789 = shalt.err (!%p786_p7)
}
  0x12   :  { %19 = dma.hbm_to_vmem [thread:$0]  %s962_s0, 128, %s17_s10, [#allocation3]  }
  0x13   :  { %s790_s25 = scalar_lea.hbm %s963_s1, 4352 }
  0x14   :  { %p791_p8 = scmp.ne.s32.totalorder %s963_s1, %s790_s25  ;;  %p794_p9 = scmp.lt.u32.totalorder %s790_s25, %s963_s1 }
  0x16   :  { %p796_p10 = pnand %p794_p9, %p791_p8 }
  0x18   :  { %799 = shalt.err (!%p796_p10)
}
  0x19   :  { %s800_s30 = scalar_lea.vmem %s862_s12, 4352  ;;  %p805_p12 = scmp.lt.s32.totalorder %s862_s12, %s862_s12 }
  0x1a   :  { %p801_p11 = scmp.ne.s32.totalorder %s862_s12, %s800_s30  ;;  %p806_p13 = scmp.lt.s32.totalorder %s800_s30, %s800_s30 }
  0x1c   :  { %p807_p0 = por %p806_p13, %p805_p12 }
  0x1e   :  { %p808_p1 = pnand %p807_p0, %p801_p11 }
  0x20   :  { %811 = shalt.err (!%p808_p1)
}
  0x21   :  { %s842_s0 = smov 64   ;;  %s843_s3 = smov 4  }
  0x22   :  { %31 = dma.hbm_to_vmem [thread:$0]  %s963_s1, 4352, %s862_s12, [#allocation6], %s842_s0, %s842_s0, %s843_s3  }
  0x23   :  { %834 = dma.done.wait [#allocation3], 128  }
  0x24   :  { %835 = vsyncadd [#allocation3], 4294967168 }
  0x25   :  { %836 = dma.done.wait [#allocation6], 4352  }
  0x26   :  { %837 = vsyncadd [#allocation6], 4294962944  ;;  %v844_v0 = vmov 0.0   ;;  %vm845_vm0 = vmmov 0   ;;  %v731_v1 = vld [vmem:[#allocation5] sm:$0xff]   ;;  %v39_v2 = vld [vmem:[#allocation2] sm:$0xff]  ;;  %v109_v18 = vlaneseq }
  0x27   :  { %638 = vmatprep.subr.bf16.mxu0 %v844_v0  ;;  %640 = vmatprep.mubr.msk.bf16.mxu0 %vm845_vm0, %v844_v0  ;;  %v40_v3 = vpack.c.bf16 %v39_v2, %v39_v2  ;;  %vm119_vm1 = vcmask 130048   ;;  %v732_v4 = vld [vmem:[#allocation5 + $0x8] sm:$0xff]   ;;  %v733_v5 = vld [vmem:[#allocation5 + $0x10] sm:$0xff]   ;;  %v734_v6 = vld [vmem:[#allocation5 + $0x18] sm:$0xff]   ;;  %s846_s1 = smov [#allocation7]   ;;  %vm548_vm2 = vcmask 64512  }
  0x28   :  { %644 = vmatprep.subr.bf16.mxu1 %v844_v0  ;;  %660 = vmatprep.mubr.msk.bf16.mxu1 %vm845_vm0, %v844_v0  ;;  %v735_v7 = vld [vmem:[#allocation5 + $0x20] sm:$0xff]   ;;  %v736_v8 = vld [vmem:[#allocation5 + $0x28] sm:$0xff]   ;;  %v737_v9 = vld [vmem:[#allocation5 + $0x30] sm:$0xff]   ;;  %v916_v19 = vshrl.u32 %v109_v18, 7  ;;  %s556_s6 = sshll.u32 %s846_s1, 4  ;;  %s557_s6 = int_to_ptr.vmem [resolvable:$true] %s556_s6 }
  0x29   :  { %639 = vmatpush3.bf16.msra.mxu0 %v731_v1  ;;  %645 = vmatpush3.bf16.msra.mxu1 %v732_v4  ;;  %v738_v10 = vld [vmem:[#allocation5 + $0x38] sm:$0xff]   ;;  %v739_v11 = vld [vmem:[#allocation5 + $0x40] sm:$0xff]   ;;  %v740_v12 = vld [vmem:[#allocation5 + $0x48] sm:$0xff]   ;;  %s812_s7 = scalar_lea.vmem %s557_s6, 128  ;;  %p817_p3 = scmp.lt.s32.totalorder %s557_s6, %s557_s6 }
  0x2a   :  { %664 = vmatprep.subr.bf16.mxu0 %v844_v0  ;;  %646 = vmatprep.subr.bf16.mxu1 %v844_v0  ;;  %v741_v13 = vld [vmem:[#allocation5 + $0x50] sm:$0xff]   ;;  %v742_v14 = vld [vmem:[#allocation5 + $0x58] sm:$0xff]   ;;  %v743_v15 = vld [vmem:[#allocation5 + $0x60] sm:$0xff]   ;;  %v111_v22 = vsub.s32 0, %v916_v19  ;;  %v167_v39 = vsub.s32 1, %v916_v19  ;;  %v261_v56 = vsub.s32 2, %v916_v19  ;;  %p813_p2 = scmp.ne.s32.totalorder %s557_s6, %s812_s7  ;;  %p818_p4 = scmp.lt.s32.totalorder %s812_s7, %s812_s7 }
  0x2b   :  { %v744_v16 = vld [vmem:[#allocation5 + $0x68] sm:$0xff]   ;;  %v745_v17 = vld [vmem:[#allocation5 + $0x70] sm:$0xff]   ;;  %v746_v31 = vld [vmem:[#allocation5 + $0x78] sm:$0xff]   ;;  %v355_v4 = vsub.s32 3, %v916_v19 }
  0x2c   :  { %641 = vmatmul.mubr.msk.bf16.vlgmr.msra.gmra.mrb[0].mxu0 %vm119_vm1, %v40_v3  ;;  %v107_v20 = vld [vmem:[#allocation5 + $0x108] sm:$0xf]  ;;  %v747_v32 = vld [vmem:[#allocation5 + $0x80] sm:$0xff]   ;;  %v749_v34 = vld [vmem:[#allocation5 + $0x90] sm:$0xff]   ;;  %p819_p5 = por %p818_p4, %p817_p3 }
  0x2d   :  { %680 = vmatprep.mubr.msk.bf16.mxu0 %vm845_vm0, %v844_v0  ;;  %647 = vmatpush3.bf16.msra.mxu1 %v733_v5  ;;  %v918_v21 = vunpack.c.l.bf16 %v107_v20  ;;  %v748_v33 = vld [vmem:[#allocation5 + $0x88] sm:$0xff]   ;;  %v750_v35 = vld [vmem:[#allocation5 + $0x98] sm:$0xff]   ;;  %v751_v36 = vld [vmem:[#allocation5 + $0xa0] sm:$0xff]  }
  0x2e   :  { %648 = vmatprep.subr.bf16.mxu1 %v844_v0  ;;  %665 = vmatpush3.bf16.msra.mxu0 %v740_v12  ;;  %v752_v37 = vld [vmem:[#allocation5 + $0xa8] sm:$0xff]   ;;  %v753_v38 = vld [vmem:[#allocation5 + $0xb0] sm:$0xff]   ;;  %v754_v48 = vld [vmem:[#allocation5 + $0xb8] sm:$0xff]   ;;  %p820_p6 = pnand %p819_p5, %p813_p2 }
  0x2f   :  { %666 = vmatprep.subr.bf16.mxu0 %v844_v0  ;;  %v112_v23 = vrot.slane %v918_v21, %v111_v22  ;;  %v168_v40 = vrot.slane %v918_v21, %v167_v39  ;;  %v755_v49 = vld [vmem:[#allocation5 + $0xc0] sm:$0xff]   ;;  %v756_v50 = vld [vmem:[#allocation5 + $0xc8] sm:$0xff]   ;;  %v757_v51 = vld [vmem:[#allocation5 + $0xd0] sm:$0xff]   ;;  %v262_v57 = vrot.slane %v918_v21, %v261_v56  ;;  %v356_v5 = vrot.slane %v918_v21, %v355_v4 }
  0x30   :  { %v758_v52 = vld [vmem:[#allocation5 + $0xd8] sm:$0xff]   ;;  %v759_v53 = vld [vmem:[#allocation5 + $0xe0] sm:$0xff]   ;;  %v760_v54 = vld [vmem:[#allocation5 + $0xe8] sm:$0xff]  }
  0x31   :  { %649 = vmatpush3.bf16.msra.mxu1 %v734_v6  ;;  %v761_v55 = vld [vmem:[#allocation5 + $0xf0] sm:$0xff]   ;;  %v762_v2 = vld [vmem:[#allocation5 + $0xf8] sm:$0xff]   ;;  %v763_v3 = vld [vmem:[#allocation5 + $0x100] sm:$0xff]  }
  0x32   :  { %650 = vmatprep.subr.bf16.mxu1 %v844_v0  ;;  %667 = vmatpush3.bf16.msra.mxu0 %v741_v13  ;;  %v449_v13 = vsub.s32 4, %v916_v19 }
  0x33   :  { %668 = vmatprep.subr.bf16.mxu0 %v844_v0 }
  0x35   :  { %651 = vmatpush3.bf16.msra.mxu1 %v735_v7 }
  0x36   :  { %652 = vmatprep.subr.bf16.mxu1 %v844_v0  ;;  %669 = vmatpush3.bf16.msra.mxu0 %v742_v14  ;;  %v450_v14 = vrot.slane %v918_v21, %v449_v13 }
  0x37   :  { %670 = vmatprep.subr.bf16.mxu0 %v844_v0 }
  0x39   :  { %653 = vmatpush3.bf16.msra.mxu1 %v736_v8 }
  0x3a   :  { %654 = vmatprep.subr.bf16.mxu1 %v844_v0  ;;  %671 = vmatpush3.bf16.msra.mxu0 %v743_v15 }
  0x3b   :  { %672 = vmatprep.subr.bf16.mxu0 %v844_v0 }
  0x3d   :  { %655 = vmatpush3.bf16.msra.mxu1 %v737_v9 }
  0x3e   :  { %656 = vmatprep.subr.bf16.mxu1 %v844_v0  ;;  %673 = vmatpush3.bf16.msra.mxu0 %v744_v16 }
  0x3f   :  { %674 = vmatprep.subr.bf16.mxu0 %v844_v0 }
  0x41   :  { %657 = vmatpush3.bf16.msra.mxu1 %v738_v10 }
  0x42   :  { %658 = vmatprep.subr.bf16.mxu1 %v844_v0  ;;  %675 = vmatpush3.bf16.msra.mxu0 %v745_v17 }
  0x43   :  { %676 = vmatprep.subr.bf16.mxu0 %v844_v0 }
  0x45   :  { %659 = vmatpush3.bf16.msra.mxu1 %v739_v11 }
  0x46   :  { %684 = vmatprep.subr.bf16.mxu1 %v844_v0  ;;  %677 = vmatpush3.bf16.msra.mxu0 %v746_v31 }
  0x47   :  { %678 = vmatprep.subr.bf16.mxu0 %v844_v0 }
  0x4a   :  { %679 = vmatpush3.bf16.msra.mxu0 %v747_v32 }
  0x4b   :  { %704 = vmatprep.subr.bf16.mxu0 %v844_v0 }
  0xff   :  { %v157_v24 = vpop.f32.mrb[0].mxu0 }
 0x100   :  { %v158_v25 = vadd.f32 %v157_v24, %v112_v23  ;;  %v642_v26 = vpop.f32.mrb[1].mxu0 }
 0x101   :  { %v160_v27 = vpop.f32.mrb[2].mxu0 }
 0x102   :  { %v163_v28 = vmax.f32 %v158_v25, 0.0  ;;  %v643_v29 = vpop.f32.mrb[3].mxu0 }
 0x104   :  { %v164_v30 = vpack.c.bf16 %v163_v28, %v163_v28 }
 0x106   :  { %661 = vmatmul.mubr.bf16.vlgmr.msra.gmra.mrb[0].mxu1 %v164_v30 }
 0x107   :  { %700 = vmatprep.mubr.msk.bf16.mxu1 %vm845_vm0, %v844_v0  ;;  %685 = vmatpush3.bf16.msra.mxu1 %v748_v33 }
 0x108   :  { %686 = vmatprep.subr.bf16.mxu1 %v844_v0 }
 0x10b   :  { %687 = vmatpush3.bf16.msra.mxu1 %v749_v34 }
 0x10c   :  { %688 = vmatprep.subr.bf16.mxu1 %v844_v0 }
 0x10f   :  { %689 = vmatpush3.bf16.msra.mxu1 %v750_v35 }
 0x110   :  { %690 = vmatprep.subr.bf16.mxu1 %v844_v0 }
 0x113   :  { %691 = vmatpush3.bf16.msra.mxu1 %v751_v36 }
 0x114   :  { %692 = vmatprep.subr.bf16.mxu1 %v844_v0 }
 0x117   :  { %693 = vmatpush3.bf16.msra.mxu1 %v752_v37 }
 0x118   :  { %694 = vmatprep.subr.bf16.mxu1 %v844_v0 }
 0x11b   :  { %695 = vmatpush3.bf16.msra.mxu1 %v753_v38 }
 0x11c   :  { %696 = vmatprep.subr.bf16.mxu1 %v844_v0 }
 0x11f   :  { %697 = vmatpush3.bf16.msra.mxu1 %v754_v48 }
 0x120   :  { %698 = vmatprep.subr.bf16.mxu1 %v844_v0 }
 0x123   :  { %699 = vmatpush3.bf16.msra.mxu1 %v755_v49 }
 0x1d9   :  { %v251_v41 = vpop.f32.mrb[0].mxu1 }
 0x1da   :  { %v252_v42 = vadd.f32 %v251_v41, %v168_v40  ;;  %v662_v43 = vpop.f32.mrb[1].mxu1 }
 0x1db   :  { %v254_v44 = vpop.f32.mrb[2].mxu1 }
 0x1dc   :  { %v257_v45 = vmax.f32 %v252_v42, 0.0  ;;  %v663_v46 = vpop.f32.mrb[3].mxu1 }
 0x1de   :  { %v258_v47 = vpack.c.bf16 %v257_v45, %v257_v45 }
 0x1e0   :  { %681 = vmatmul.mubr.bf16.vlgmr.msra.gmra.mrb[4].mxu0 %v258_v47 }
 0x1e1   :  { %720 = vmatprep.mubr.msk.bf16.mxu0 %vm845_vm0, %v844_v0  ;;  %705 = vmatpush3.bf16.msra.mxu0 %v756_v50 }
 0x1e2   :  { %706 = vmatprep.subr.bf16.mxu0 %v844_v0 }
 0x1e5   :  { %707 = vmatpush3.bf16.msra.mxu0 %v757_v51 }
 0x1e6   :  { %708 = vmatprep.subr.bf16.mxu0 %v844_v0 }
 0x1e9   :  { %709 = vmatpush3.bf16.msra.mxu0 %v758_v52 }
 0x1ea   :  { %710 = vmatprep.subr.bf16.mxu0 %v844_v0 }
 0x1ed   :  { %711 = vmatpush3.bf16.msra.mxu0 %v759_v53 }
 0x1ee   :  { %712 = vmatprep.subr.bf16.mxu0 %v844_v0 }
 0x1f1   :  { %713 = vmatpush3.bf16.msra.mxu0 %v760_v54 }
 0x1f2   :  { %714 = vmatprep.subr.bf16.mxu0 %v844_v0 }
 0x1f5   :  { %715 = vmatpush3.bf16.msra.mxu0 %v761_v55 }
 0x1f6   :  { %716 = vmatprep.subr.bf16.mxu0 %v844_v0 }
 0x1f9   :  { %717 = vmatpush3.bf16.msra.mxu0 %v762_v2 }
 0x1fa   :  { %718 = vmatprep.subr.bf16.mxu0 %v844_v0 }
 0x1fd   :  { %719 = vmatpush3.bf16.msra.mxu0 %v763_v3 }
 0x2b3   :  { %v345_v58 = vpop.f32.mrb[4].mxu0 }
 0x2b4   :  { %v346_v59 = vadd.f32 %v345_v58, %v262_v57  ;;  %v682_v60 = vpop.f32.mrb[5].mxu0 }
 0x2b5   :  { %v348_v61 = vpop.f32.mrb[6].mxu0 }
 0x2b6   :  { %v351_v62 = vmax.f32 %v346_v59, 0.0  ;;  %v683_v63 = vpop.f32.mrb[7].mxu0 }
 0x2b8   :  { %v352_v1 = vpack.c.bf16 %v351_v62, %v351_v62 }
 0x2ba   :  { %701 = vmatmul.mubr.bf16.vlgmr.msra.gmra.mrb[4].mxu1 %v352_v1 }
 0x38d   :  { %v439_v6 = vpop.f32.mrb[4].mxu1 }
 0x38e   :  { %v440_v7 = vadd.f32 %v439_v6, %v356_v5  ;;  %v702_v8 = vpop.f32.mrb[5].mxu1 }
 0x38f   :  { %v442_v9 = vpop.f32.mrb[6].mxu1 }
 0x390   :  { %v445_v10 = vmax.f32 %v440_v7, 0.0  ;;  %v703_v11 = vpop.f32.mrb[7].mxu1 }
 0x392   :  { %v446_v12 = vpack.c.bf16 %v445_v10, %v445_v10 }
 0x394   :  { %721 = vmatmul.mubr.bf16.vlgmr.msra.gmra.mrb[8].mxu0 %v446_v12 }
 0x467   :  { %v533_v15 = vpop.f32.mrb[8].mxu0 }
 0x468   :  { %v534_v0 = vadd.f32 %v533_v15, %v450_v14  ;;  %v722_v16 = vpop.f32.mrb[9].mxu0 }
 0x469   :  { %v536_v17 = vpop.f32.mrb[10].mxu0 }
 0x46a   :  { %539 = vmax.xlane.f32.xlu0 %v534_v0  ;;  %v723_v18 = vpop.f32.mrb[11].mxu0 }
 0x4f7   :  { %v540_v20 = vpop.xlane.xlu0 %539 }
 0x4f8   :  { %v541_v22 = vsub.f32 %v534_v0, %v540_v20 }
 0x4fa   :  { %v542_v23 = vmul.f32 1.442695, %v541_v22 }
 0x4fc   :  { %764 = vpow2.f32 %v542_v23 }
 0x506   :  { %v765_v24 = vpop.eup %764 }
 0x507   :  { %544 = vadd.xlane.f32.xlu0 %v765_v24 }
 0x594   :  { %v545_v25 = vpop.xlane.xlu0 %544 }
 0x595   :  { %766 = vrcp.f32 %v545_v25 }
 0x59f   :  { %v767_v26 = vpop.eup %766 }
 0x5a0   :  { %v547_v19 = vmul.f32 %v767_v26, %v765_v24 }
 0x5a2   :  { %549 = vst.msk [vmem:[#allocation7] sm:$0xff] %vm548_vm2, %v547_v19 }
 0x5a3   :  { %823 = shalt.err (!%p820_p6)
}
 0x5a4   :  { %s824_s10 = scalar_lea.hbm %s964_s2, 128 }
 0x5a5   :  { %p825_p7 = scmp.ne.s32.totalorder %s964_s2, %s824_s10  ;;  %p828_p8 = scmp.lt.u32.totalorder %s824_s10, %s964_s2 }
 0x5a7   :  { %p830_p9 = pnand %p828_p8, %p825_p7 }
 0x5a9   :  { %833 = shalt.err (!%p830_p9)
}
 0x5aa   :  { %559 = dma.vmem_to_hbm [thread:$0]  %s557_s6, 128, %s964_s2, [#allocation4]  }
 0x5ab   :  { %838 = dma.done.wait [#allocation4], 128  }
 0x5ac   :  { %839 = vsyncadd [#allocation4], 4294967168 }
 0x5ad   :  { %563 = vsyncpa [#allocation3], 1 }
 0x5ae   :  { %564 = vsyncpa [#allocation6], 1 }
 0x5af   :  { %565 = vsyncpa [#allocation4], 1 }

</bundles_post_ra>
